<compile_context>
chip_gen: v7x
topology: tpu7x:2x2x1
jax: 0.10.0
libtpu: 0.0.40
codegen_flags: <defaults>
</compile_context>

<pallas_src>
import functools

import jax
import jax.numpy as jnp
from jax.experimental import pallas as pl
from jax.experimental.pallas import tpu as pltpu

LANES = 128
SUBLANES = 8
EPS = 1e-7        # matches the PyTorch module's 1e-07
NSPLIT = 2        # megacore split (v7x has 2 TCs; extra split is free on 1-TC chips)


def _round_up(x, m):
    return ((x + m - 1) // m) * m


def _poisson_loss_kernel(x_ref, t_ref, o_ref):
    # Zero this split's accumulator (output block is resident across axis 1).
    @pl.when(pl.program_id(1) == 0)
    def _():
        o_ref[...] = jnp.zeros_like(o_ref)

    x = x_ref[...].astype(jnp.float32)
    t = t_ref[...].astype(jnp.float32)
    term = x - t * jnp.log(x + EPS)                       # VPU + EUP (log)
    # Fold rows 8-at-a-time: pure vreg adds on the VPU, no cross-lane reduce
    # and no scalar loop-carried dependency in the hot loop.
    folded = jnp.sum(term.reshape(-1, SUBLANES, LANES), axis=0)
    o_ref[...] += folded[None, :, :]


@functools.partial(jax.jit, static_argnames=("tile_rows",))
def poisson_loss(inputs, targets, *, tile_rows=1024):
    assert inputs.shape == targets.shape
    n_total = inputs.size

    x_flat = inputs.reshape(-1)
    t_flat = targets.reshape(-1)

    rows = pl.cdiv(n_total, LANES)
    # Tile must be a multiple of 16 rows (bf16-safe, and >= one f32 vreg) and
    # no larger than needed for small inputs.
    tile = _round_up(min(tile_rows, _round_up(rows, 2 * SUBLANES)), 2 * SUBLANES)
    rows_padded = _round_up(rows, NSPLIT * tile)
    n_padded = rows_padded * LANES
    steps = rows_padded // (NSPLIT * tile)

    if n_padded != n_total:
        pad = n_padded - n_total
        # Zero padding contributes 0 - 0*log(eps) == 0 to the sum.
        x_flat = jnp.pad(x_flat, (0, pad))
        t_flat = jnp.pad(t_flat, (0, pad))

    x2d = x_flat.reshape(rows_padded, LANES)
    t2d = t_flat.reshape(rows_padded, LANES)

    in_map = lambda s, i: (s * steps + i, 0)
    itemsize = jnp.dtype(inputs.dtype).itemsize

    partials = pl.pallas_call(
        _poisson_loss_kernel,
        out_shape=jax.ShapeDtypeStruct((NSPLIT, SUBLANES, LANES), jnp.float32),
        grid=(NSPLIT, steps),
        in_specs=[
            pl.BlockSpec((tile, LANES), in_map),
            pl.BlockSpec((tile, LANES), in_map),
        ],
        out_specs=pl.BlockSpec((1, SUBLANES, LANES), lambda s, i: (s, 0, 0)),
        compiler_params=pltpu.CompilerParams(
            dimension_semantics=("parallel", "arbitrary"),
        ),
        cost_estimate=pl.CostEstimate(
            flops=3 * n_total,
            transcendentals=n_total,
            bytes_accessed=2 * n_padded * itemsize + NSPLIT * SUBLANES * LANES * 4,
        ),
    )(x2d, t2d)

    # Single tiny cross-lane reduce + mean, done once outside the hot loop.
    return jnp.sum(partials) / jnp.float32(n_total)


if __name__ == "__main__":
    key = jax.random.PRNGKey(0)
    k1, k2 = jax.random.split(key)
    # Small NCHW shapes: batch=2, channels=4, spatial=16x16 -> 2048 elems.
    x = jax.random.uniform(k1, (2, 4, 16, 16), dtype=jnp.float32, minval=0.1, maxval=2.0)
    t = jax.random.uniform(k2, (2, 4, 16, 16), dtype=jnp.float32, minval=0.0, maxval=3.0)

    loss = poisson_loss(x, t)
    loss = jax.block_until_ready(loss)

    # Reference check in plain JAX.
    ref = jnp.mean(x - t * jnp.log(x + EPS))
    assert jnp.allclose(loss, ref, rtol=1e-5, atol=1e-6), (loss, ref)

    print("KERNEL_OK")
</pallas_src>

<mosaic_0001>
module attributes {stable_mosaic.version = 11 : i64} {
  func.func @_poisson_loss_kernel(%arg0: i32, %arg1: i32, %arg2: memref<16x128xf32, #tpu.memory_space<vmem>>, %arg3: memref<16x128xf32, #tpu.memory_space<vmem>>, %arg4: memref<1x8x128xf32, #tpu.memory_space<vmem>>) attributes {dimension_semantics = [#tpu.dimension_semantics<parallel>, #tpu.dimension_semantics<arbitrary>], iteration_bounds = array<i64: 2, 1>, scalar_prefetch = 0 : i64, scratch_operands = 0 : i64, tpu.core_type = #tpu.core_type<tc>, window_params = [{transform_indices = @transform_0, window_bounds = array<i64: 16, 128>}, {transform_indices = @transform_1, window_bounds = array<i64: 16, 128>}, {transform_indices = @transform_2, window_bounds = array<i64: 1, 8, 128>}]} {
    %c0_i32 = arith.constant 0 : i32
    %0 = arith.cmpi eq, %arg1, %c0_i32 : i32
    %1 = arith.extui %0 : i1 to i32
    %c0_i32_0 = arith.constant 0 : i32
    %2 = arith.cmpi ne, %1, %c0_i32_0 : i32
    scf.if %2 {
      %cst_11 = arith.constant 0.000000e+00 : f32
      %16 = vector.broadcast %cst_11 : f32 to vector<1x8x128xf32>
      %c0_12 = arith.constant 0 : index
      %c0_13 = arith.constant 0 : index
      %c0_14 = arith.constant 0 : index
      %17 = vector.load %arg4[%c0_12, %c0_13, %c0_14] : memref<1x8x128xf32, #tpu.memory_space<vmem>>, vector<1x8x128xf32>
      tpu.vector_store %arg4[%c0_12, %c0_13, %c0_14], %16 {strides = array<i32>} : memref<1x8x128xf32, #tpu.memory_space<vmem>>, vector<1x8x128xf32>,
    } else {
    }
    %c0 = arith.constant 0 : index
    %c0_1 = arith.constant 0 : index
    %3 = vector.load %arg2[%c0, %c0_1] : memref<16x128xf32, #tpu.memory_space<vmem>>, vector<16x128xf32>
    %c0_2 = arith.constant 0 : index
    %c0_3 = arith.constant 0 : index
    %4 = vector.load %arg3[%c0_2, %c0_3] : memref<16x128xf32, #tpu.memory_space<vmem>>, vector<16x128xf32>
    %cst = arith.constant 1.000000e-07 : f32
    %5 = vector.broadcast %cst : f32 to vector<16x128xf32>
    %6 = arith.addf %3, %5 : vector<16x128xf32>
    %7 = math.log %6 : vector<16x128xf32>
    %8 = arith.mulf %4, %7 : vector<16x128xf32>
    %9 = arith.subf %3, %8 : vector<16x128xf32>
    %10 = vector.shape_cast %9 : vector<16x128xf32> to vector<2x8x128xf32>
    %cst_4 = arith.constant dense<0.000000e+00> : vector<8x128xf32>
    %11 = vector.multi_reduction <add>, %10, %cst_4 [0] : vector<2x8x128xf32> to vector<8x128xf32>
    %c0_5 = arith.constant 0 : index
    %c0_6 = arith.constant 0 : index
    %c0_7 = arith.constant 0 : index
    %12 = vector.load %arg4[%c0_5, %c0_6, %c0_7] : memref<1x8x128xf32, #tpu.memory_space<vmem>>, vector<1x8x128xf32>
    %13 = vector.shape_cast %11 : vector<8x128xf32> to vector<1x8x128xf32>
    %14 = arith.addf %12, %13 : vector<1x8x128xf32>
    %c0_8 = arith.constant 0 : index
    %c0_9 = arith.constant 0 : index
    %c0_10 = arith.constant 0 : index
    %15 = vector.load %arg4[%c0_8, %c0_9, %c0_10] : memref<1x8x128xf32, #tpu.memory_space<vmem>>, vector<1x8x128xf32>
    tpu.vector_store %arg4[%c0_8, %c0_9, %c0_10], %14 {strides = array<i32>} : memref<1x8x128xf32, #tpu.memory_space<vmem>>, vector<1x8x128xf32>,
    return
  }
  func.func @transform_0(%arg0: i32, %arg1: i32) -> (i32, i32) {
    %c1_i32 = arith.constant 1 : i32
    %0 = arith.muli %arg0, %c1_i32 : i32
    %1 = arith.addi %0, %arg1 : i32
    %c0_i32 = arith.constant 0 : i32
    %c0_i32_0 = arith.constant 0 : i32
    return %1, %c0_i32 : i32, i32
  }
  func.func @transform_1(%arg0: i32, %arg1: i32) -> (i32, i32) {
    %c1_i32 = arith.constant 1 : i32
    %0 = arith.muli %arg0, %c1_i32 : i32
    %1 = arith.addi %0, %arg1 : i32
    %c0_i32 = arith.constant 0 : i32
    %c0_i32_0 = arith.constant 0 : i32
    return %1, %c0_i32 : i32, i32
  }
  func.func @transform_2(%arg0: i32, %arg1: i32) -> (i32, i32, i32) {
    %c0_i32 = arith.constant 0 : i32
    %c0_i32_0 = arith.constant 0 : i32
    %c0_i32_1 = arith.constant 0 : i32
    return %arg0, %c0_i32, %c0_i32_0 : i32, i32, i32
  }
}

</mosaic_0001>

<bundles_post_ra>
// kernel: poisson_loss.1
= control target key start
LH: loop header
LB: loop body
LE: loop exit
PB: predicated region body
PF: predicated region fallthrough
CT: control target
= control target key end

     0   :  { %s368_s9 = smov 0   ;;  %s370_s10 = smov 0   ;;  %s404_s0 = inlined_call_operand.vmem [shape: f32[32,128], index: 0, kind: input, shape index: {}]   ;;  %s405_s1 = inlined_call_operand.vmem [shape: f32[32,128], index: 1, kind: input, shape index: {}]   ;;  %s406_s2 = inlined_call_operand.vmem [shape: f32[2,8,128], index: 2, kind: output, shape index: {}]  }
   0x1   :  { %s372_s11 = smov 0  }
   0x2 LB: > { %s24_s12 = sadd.s32 1, %s347_s10  ;;  %p292_p0 = scmp.ge.s32.totalorder %s351_s11, 1  ;;  %s351_s11 = sphi %s372_s11, %s12_s11   ;;  %s347_s10 = sphi %s370_s10, %s408_s10   ;;  %s343_s9 = sphi %s368_s9, %s407_s9  }
   0x3   : > { %p26_p1 = scmp.ge.s32.totalorder %s24_s12, 2  ;;  %p144_p2 = scmp.lt.s32.totalorder %s351_s11, 3 }
   0x5   : > { %s410_s12 = smov (%p26_p1, %s24_s12), 0  ;;  %p145_p3 = pnand %p292_p0, %p144_p2 }
   0x6   : > { %s293_s13 = sshll.u32 (!%p145_p3), %s343_s9, 1  ;;  %p188_p5 = scmp.lt.s32.totalorder (!%p145_p3), %s343_s9, 1 }
   0x7   : > { %148 = sbr.rel (%p145_p3) target bundleno = 41 (0x29), region = 28  ;;  %p174_p4 = scmp.lt.s32.totalorder (!%p145_p3), %s293_s13, 3 }
   0xe   : > { %s412_s13 = smov (!%p174_p4, %s293_s13), 3  ;;  %s414_s9 = smov (!%p188_p5, %s343_s9), 1 }
   0xf   : > { %s294_s14 = sshll.u32 %s412_s13, 3  ;;  %s297_s21 = sshll.u32 %s414_s9, 3 }
  0x10   : > { %s177_s17 = scalar_lea.vmem %s404_s0, %s294_s14  ;;  %s185_s20 = scalar_lea.vmem %s405_s1, %s294_s14 }
  0x11   : > { %v197_v0 = vld [vmem:[%s177_s17] sm:$0xff]  ;;  %v198_v1 = vld [vmem:[%s177_s17 + $0x8] sm:$0xff]  ;;  %s191_s24 = scalar_lea.vmem %s406_s2, %s297_s21 }
  0x12   : > { %v201_v2 = vadd.f32 1e-07, %v197_v0  ;;  %v202_v3 = vadd.f32 1e-07, %v198_v1  ;;  %v199_v5 = vld [vmem:[%s185_s20] sm:$0xff]  ;;  %v200_v7 = vld [vmem:[%s185_s20 + $0x8] sm:$0xff] }
  0x14   : > { %325 = vlog2.f32 %v201_v2 }
  0x15   : > { %327 = vlog2.f32 %v202_v3 }
  0x1e   : > { %v326_v4 = vpop.eup %325 }
  0x1f   : > { %v328_v6 = vpop.eup %327  ;;  %v204_v8 = vmul.f32 0.6931472, %v326_v4 }
  0x20   : > { %v206_v9 = vmul.f32 0.6931472, %v328_v6 }
  0x21   : > { %v207_v10 = vmul.f32 %v204_v8, %v199_v5 }
  0x22   : > { %v208_v11 = vmul.f32 %v206_v9, %v200_v7 }
  0x23   : > { %v209_v12 = vsub.f32 %v197_v0, %v207_v10 }
  0x24   : > { %v210_v13 = vsub.f32 %v198_v1, %v208_v11 }
  0x26   : > { %v211_v14 = vadd.f32 %v210_v13, %v209_v12 }
  0x28   : > { %214 = vst [vmem:[%s191_s24] sm:$0xff] %v211_v14 }
  0x29 PF: > { %s12_s11 = sadd.s32 1, %s351_s11   ;;  %s407_s9 = smov %s347_s10 }
  0x2a   : > { %p9_p6 = scmp.ge.s32.totalorder %s12_s11, 4   ;;  %s408_s10 = smov %s410_s12 }
  0x2c   :  { %11 = sbr.rel (!%p9_p6) target bundleno = 2 (0x2), region = 65 }

</bundles_post_ra>
